<compile_context>
chip_gen: v7x
topology: tpu7x:2x2x1
jax: 0.10.0
libtpu: 0.0.40
codegen_flags: <defaults>
</compile_context>

<pallas_src>
import jax
import jax.numpy as jnp
from jax.experimental import pallas as pl
from jax.experimental.pallas import tpu as pltpu

FEATURES = 1280          # fixed by the module (EfficientNet-B0 feature dim)
_LANE = 128              # output last dim padded to a multiple of this
_SUBLANE_F32 = 8         # f32 sublane packing: row tile kept a multiple of this


def _round_up(x: int, m: int) -> int:
    return (x + m - 1) // m * m


def _cdiv(a: int, b: int) -> int:
    return -(-a // b)


def _vmem_capacity_bytes() -> int:
    try:
        return int(pltpu.get_tpu_info().vmem_capacity_bytes)
    except Exception:
        return 64 * 1024 * 1024  # conservative default (v7x per-TC VMEM)


def prepare_classifier_params(weight, bias):
    """One-time (parameter-load time) prep of the Linear(1280, C) parameters.

    weight: (num_classes, 1280) float32 -- PyTorch nn.Linear layout.
    bias:   (num_classes,) float32
    Returns (w_bf16 (1280, c_pad) bfloat16, bias2d (1, c_pad) float32, num_classes).
    """
    num_classes, f = weight.shape
    assert f == FEATURES
    c_pad = _round_up(num_classes, _LANE)
    w_t = jnp.asarray(weight).T.astype(jnp.bfloat16)        # (1280, C) bf16
    b = jnp.asarray(bias).astype(jnp.float32)
    if c_pad != num_classes:
        w_t = jnp.pad(w_t, ((0, 0), (0, c_pad - num_classes)))
        b = jnp.pad(b, (0, c_pad - num_classes))
    return w_t, b.reshape(1, c_pad), num_classes


def _classifier_kernel(x_ref, w_ref, b_ref, o_ref):
    # x_ref: (TN, 1280) f32   w_ref: (1280, TC) bf16
    # b_ref: (1, TC) f32      o_ref: (TN, TC) out_dtype
    x = x_ref[...].astype(jnp.bfloat16)              # cast in-kernel (VPU slot)
    y = jnp.dot(x, w_ref[...], preferred_element_type=jnp.float32)
    o_ref[...] = (y + b_ref[...]).astype(o_ref.dtype)


def _build_call(n, tile, tile_c, c_pad, out_dtype, vmem_limit, cost,
                single_buffer_params):
    n_blocks = _cdiv(n, tile)
    c_blocks = c_pad // tile_c
    param_mode = (
        dict(pipeline_mode=pl.Buffered(buffer_count=1))
        if single_buffer_params else {}
    )
    return pl.pallas_call(
        _classifier_kernel,
        out_shape=jax.ShapeDtypeStruct((n, c_pad), out_dtype),
        grid_spec=pltpu.PrefetchScalarGridSpec(
            num_scalar_prefetch=0,
            grid=(n_blocks, c_blocks),
            in_specs=[
                pl.BlockSpec((tile, FEATURES), lambda i, j: (i, 0)),
                pl.BlockSpec((FEATURES, tile_c), lambda i, j: (0, j), **param_mode),
                pl.BlockSpec((1, tile_c), lambda i, j: (0, j), **param_mode),
            ],
            out_specs=pl.BlockSpec((tile, tile_c), lambda i, j: (i, j)),
        ),
        compiler_params=pltpu.CompilerParams(
            dimension_semantics=("parallel", "parallel"),
            vmem_limit_bytes=vmem_limit,
        ),
        cost_estimate=cost,
    )


def efficientnet_classifier(x, w_bf16, bias2d, num_classes, *, tile_n=None,
                            out_dtype=jnp.float32, trim=True):
    """Forward pass: Dropout(0.2) [eval: identity] + Linear(1280, num_classes).

    x:       (N, 1280) float32 activations.
    w_bf16:  (1280, c_pad) bfloat16 padded weight from prepare_classifier_params.
    bias2d:  (1, c_pad) float32 padded bias from prepare_classifier_params.
    Returns (N, num_classes) logits; or (N, c_pad) zero-padded when trim=False
    (pad columns are exactly 0 -- mask before any argmax over the padded tensor).
    """
    n, f = x.shape
    assert f == FEATURES
    c_pad = w_bf16.shape[1]
    assert c_pad % _LANE == 0 and c_pad >= num_classes

    vmem_cap = _vmem_capacity_bytes()
    if tile_n is None:
        # Big row tiles on 128-MiB-VMEM parts (v5e/v6e); stay modest on v7x (64 MiB).
        tile_n = 1024 if vmem_cap >= (96 << 20) else 512

    # Row tile: multiple of 8 (f32 sublane); no padding of x, cdiv grid handles
    # the ragged final block (its out-of-range output rows are dropped).
    tile = min(tile_n, _round_up(n, _SUBLANE_F32))
    tile = _round_up(tile, _SUBLANE_F32)
    n_blocks = _cdiv(n, tile)

    # Split the class dim only when a single row block would leave the second
    # TensorCore idle (small-batch inference); otherwise keep the weight as one
    # block so it is DMA'd exactly once.
    if n_blocks == 1 and c_pad >= 2 * _LANE and (c_pad // 2) % _LANE == 0:
        tile_c = c_pad // 2
    else:
        tile_c = c_pad

    out_bytes = jnp.dtype(out_dtype).itemsize
    footprint = (
        2 * tile * FEATURES * 4          # x tiles (f32), double-buffered
        + 2 * tile * tile_c * out_bytes  # out tiles, double-buffered
        + 2 * FEATURES * tile_c * 2      # weight (bf16), worst case 2 buffers
        + 2 * tile_c * 4                 # bias
    )
    vmem_limit = int(min(max(footprint + (8 << 20), 16 << 20),
                         48 << 20, (vmem_cap * 3) // 4))

    cost = pl.CostEstimate(
        flops=2 * n * FEATURES * c_pad,
        transcendentals=0,
        bytes_accessed=(
            n * FEATURES * 4           # x (f32)
            + FEATURES * c_pad * 2     # weight (bf16)
            + c_pad * 4                # bias
            + n * c_pad * out_bytes    # out
        ),
    )

    try:
        out = _build_call(n, tile, tile_c, c_pad, out_dtype, vmem_limit, cost,
                          single_buffer_params=True)(x, w_bf16, bias2d)
    except Exception:
        # Fallback if this runtime rejects pl.Buffered on top-level BlockSpecs.
        out = _build_call(n, tile, tile_c, c_pad, out_dtype, vmem_limit, cost,
                          single_buffer_params=False)(x, w_bf16, bias2d)

    if trim and c_pad != num_classes:
        out = out[:, :num_classes]
    return out


if __name__ == "__main__":
    num_classes = 16
    batch = 8

    key = jax.random.PRNGKey(0)
    kx, kw, kb = jax.random.split(key, 3)
    bound = 1.0 / (FEATURES ** 0.5)
    # PyTorch nn.Linear(1280, C) stores weight as (C, 1280).
    weight = jax.random.uniform(kw, (num_classes, FEATURES), jnp.float32, -bound, bound)
    bias = jax.random.uniform(kb, (num_classes,), jnp.float32, -bound, bound)
    x = jax.random.normal(kx, (batch, FEATURES), jnp.float32)

    # Parameter prep happens once, at load time -- not per forward call.
    w_bf16, bias2d, nc = prepare_classifier_params(weight, bias)

    y = efficientnet_classifier(x, w_bf16, bias2d, nc)
    y = jax.block_until_ready(y)
    assert y.shape == (batch, num_classes)

    # Tight check against a bf16-matmul / f32-accumulate reference (kernel numerics).
    xb = x.astype(jnp.bfloat16).astype(jnp.float32)
    wb = weight.T.astype(jnp.bfloat16).astype(jnp.float32)
    y_ref_bf16 = xb @ wb + bias[None, :]
    assert jnp.allclose(y, y_ref_bf16, atol=2e-3, rtol=2e-3), "mismatch vs bf16 reference"

    # Loose check against full-f32 PyTorch semantics (bf16 rounding only).
    y_ref_f32 = x @ weight.T + bias[None, :]
    assert jnp.allclose(y, y_ref_f32, atol=5e-2, rtol=5e-2), "mismatch vs f32 reference"

    print("KERNEL_OK")
</pallas_src>

<mosaic_0001>
module attributes {stable_mosaic.version = 11 : i64} {
  func.func @_classifier_kernel(%arg0: i32, %arg1: i32, %arg2: memref<8x1280xf32, #tpu.memory_space<vmem>>, %arg3: memref<1280x128xbf16, #tpu.memory_space<vmem>>, %arg4: memref<1x128xf32, #tpu.memory_space<vmem>>, %arg5: memref<8x128xf32, #tpu.memory_space<vmem>>) attributes {dimension_semantics = [#tpu.dimension_semantics<parallel>, #tpu.dimension_semantics<parallel>], iteration_bounds = array<i64: 1, 1>, scalar_prefetch = 0 : i64, scratch_operands = 0 : i64, tpu.core_type = #tpu.core_type<tc>, window_params = [{transform_indices = @transform_0, window_bounds = array<i64: 8, 1280>}, {pipeline_mode = #tpu.pipeline_mode<synchronous>, transform_indices = @transform_1, window_bounds = array<i64: 1280, 128>}, {pipeline_mode = #tpu.pipeline_mode<synchronous>, transform_indices = @transform_2, window_bounds = array<i64: 1, 128>}, {transform_indices = @transform_3, window_bounds = array<i64: 8, 128>}]} {
    %c0 = arith.constant 0 : index
    %c0_0 = arith.constant 0 : index
    %0 = vector.load %arg2[%c0, %c0_0] : memref<8x1280xf32, #tpu.memory_space<vmem>>, vector<8x1280xf32>
    %1 = arith.truncf %0 : vector<8x1280xf32> to vector<8x1280xbf16>
    %c0_1 = arith.constant 0 : index
    %c0_2 = arith.constant 0 : index
    %2 = vector.load %arg3[%c0_1, %c0_2] : memref<1280x128xbf16, #tpu.memory_space<vmem>>, vector<1280x128xbf16>
    %cst = arith.constant dense<0.000000e+00> : vector<8x128xf32>
    %3 = tpu.matmul %1, %2, %cst {dimension_numbers = #tpu.dot_dimension_numbers<[1], [0], [0], [1], [0, 0, 1, 1], [], []>} : vector<8x1280xbf16>, vector<1280x128xbf16>, vector<8x128xf32> -> vector<8x128xf32>
    %c0_3 = arith.constant 0 : index
    %c0_4 = arith.constant 0 : index
    %4 = vector.load %arg4[%c0_3, %c0_4] : memref<1x128xf32, #tpu.memory_space<vmem>>, vector<1x128xf32>
    %5 = vector.broadcast %4 : vector<1x128xf32> to vector<8x128xf32>
    %6 = arith.addf %3, %5 : vector<8x128xf32>
    %c0_5 = arith.constant 0 : index
    %c0_6 = arith.constant 0 : index
    %7 = vector.load %arg5[%c0_5, %c0_6] : memref<8x128xf32, #tpu.memory_space<vmem>>, vector<8x128xf32>
    tpu.vector_store %arg5[%c0_5, %c0_6], %6 {strides = array<i32>} : memref<8x128xf32, #tpu.memory_space<vmem>>, vector<8x128xf32>,
    return
  }
  func.func @transform_0(%arg0: i32, %arg1: i32) -> (i32, i32) {
    %c0_i32 = arith.constant 0 : i32
    %c0_i32_0 = arith.constant 0 : i32
    return %arg0, %c0_i32 : i32, i32
  }
  func.func @transform_1(%arg0: i32, %arg1: i32) -> (i32, i32) {
    %c0_i32 = arith.constant 0 : i32
    %c0_i32_0 = arith.constant 0 : i32
    return %c0_i32, %arg1 : i32, i32
  }
  func.func @transform_2(%arg0: i32, %arg1: i32) -> (i32, i32) {
    %c0_i32 = arith.constant 0 : i32
    %c0_i32_0 = arith.constant 0 : i32
    return %c0_i32, %arg1 : i32, i32
  }
  func.func @transform_3(%arg0: i32, %arg1: i32) -> (i32, i32) {
    %c0_i32 = arith.constant 0 : i32
    return %arg0, %arg1 : i32, i32
  }
}

module attributes {stable_mosaic.version = 11 : i64} {
  func.func @_classifier_kernel(%arg0: i32, %arg1: i32, %arg2: memref<8x1280xf32, #tpu.memory_space<vmem>>, %arg3: memref<1280x128xbf16, #tpu.memory_space<vmem>>, %arg4: memref<1x128xf32, #tpu.memory_space<vmem>>, %arg5: memref<8x128xf32, #tpu.memory_space<vmem>>) attributes {dimension_semantics = [#tpu.dimension_semantics<parallel>, #tpu.dimension_semantics<parallel>], iteration_bounds = array<i64: 1, 1>, scalar_prefetch = 0 : i64, scratch_operands = 0 : i64, tpu.core_type = #tpu.core_type<tc>, window_params = [{transform_indices = @transform_0, window_bounds = array<i64: 8, 1280>}, {transform_indices = @transform_1, window_bounds = array<i64: 1280, 128>}, {transform_indices = @transform_2, window_bounds = array<i64: 1, 128>}, {transform_indices = @transform_3, window_bounds = array<i64: 8, 128>}]} {
    %c0 = arith.constant 0 : index
    %c0_0 = arith.constant 0 : index
    %0 = vector.load %arg2[%c0, %c0_0] : memref<8x1280xf32, #tpu.memory_space<vmem>>, vector<8x1280xf32>
    %1 = arith.truncf %0 : vector<8x1280xf32> to vector<8x1280xbf16>
    %c0_1 = arith.constant 0 : index
    %c0_2 = arith.constant 0 : index
    %2 = vector.load %arg3[%c0_1, %c0_2] : memref<1280x128xbf16, #tpu.memory_space<vmem>>, vector<1280x128xbf16>
    %cst = arith.constant dense<0.000000e+00> : vector<8x128xf32>
    %3 = tpu.matmul %1, %2, %cst {dimension_numbers = #tpu.dot_dimension_numbers<[1], [0], [0], [1], [0, 0, 1, 1], [], []>} : vector<8x1280xbf16>, vector<1280x128xbf16>, vector<8x128xf32> -> vector<8x128xf32>
    %c0_3 = arith.constant 0 : index
    %c0_4 = arith.constant 0 : index
    %4 = vector.load %arg4[%c0_3, %c0_4] : memref<1x128xf32, #tpu.memory_space<vmem>>, vector<1x128xf32>
    %5 = vector.broadcast %4 : vector<1x128xf32> to vector<8x128xf32>
    %6 = arith.addf %3, %5 : vector<8x128xf32>
    %c0_5 = arith.constant 0 : index
    %c0_6 = arith.constant 0 : index
    %7 = vector.load %arg5[%c0_5, %c0_6] : memref<8x128xf32, #tpu.memory_space<vmem>>, vector<8x128xf32>
    tpu.vector_store %arg5[%c0_5, %c0_6], %6 {strides = array<i32>} : memref<8x128xf32, #tpu.memory_space<vmem>>, vector<8x128xf32>,
    return
  }
  func.func @transform_0(%arg0: i32, %arg1: i32) -> (i32, i32) {
    %c0_i32 = arith.constant 0 : i32
    %c0_i32_0 = arith.constant 0 : i32
    return %arg0, %c0_i32 : i32, i32
  }
  func.func @transform_1(%arg0: i32, %arg1: i32) -> (i32, i32) {
    %c0_i32 = arith.constant 0 : i32
    %c0_i32_0 = arith.constant 0 : i32
    return %c0_i32, %arg1 : i32, i32
  }
  func.func @transform_2(%arg0: i32, %arg1: i32) -> (i32, i32) {
    %c0_i32 = arith.constant 0 : i32
    %c0_i32_0 = arith.constant 0 : i32
    return %c0_i32, %arg1 : i32, i32
  }
  func.func @transform_3(%arg0: i32, %arg1: i32) -> (i32, i32) {
    %c0_i32 = arith.constant 0 : i32
    return %arg0, %arg1 : i32, i32
  }
}

</mosaic_0001>

<bundles_post_ra>
// kernel: tpu_custom_call.1
= control target key start
LH: loop header
LB: loop body
LE: loop exit
PB: predicated region body
PF: predicated region fallthrough
CT: control target
= control target key end

     0   :  { %8 = vsyncpa [#allocation3], 0  ;;  %s1345_s0 = inlined_call_operand.hbm [shape: f32[8,1280], index: 0, kind: input, shape index: {}]   ;;  %s1346_s1 = inlined_call_operand.hbm [shape: bf16[1280,128], index: 1, kind: input, shape index: {}]   ;;  %s1347_s2 = inlined_call_operand.vmem [shape: f32[1,128], index: 2, kind: input, shape index: {}]   ;;  %s1348_s3 = inlined_call_operand.hbm [shape: f32[8,128], index: 3, kind: output, shape index: {}]  }
   0x1   :  { %9 = vsyncpa [#allocation6], 0 }
   0x2   :  { %10 = vsyncpa [#allocation4], 0  ;;  %s1274_s12 = smov [#allocation2]   ;;  %s1275_s14 = smov [#allocation5]  }
   0x3   :  { %s17_s13 = sshll.u32 %s1274_s12, 4  ;;  %s26_s15 = sshll.u32 %s1275_s14, 4  ;;  %s18_s13 = int_to_ptr.vmem [resolvable:$true] %s17_s13  ;;  %s1299_s15 = int_to_ptr.vmem [resolvable:$true] %s26_s15 }
   0x4   :  { %s1202_s18 = scalar_lea.hbm %s1345_s0, 1280 }
   0x5   :  { %p1203_p0 = scmp.ne.s32.totalorder %s1345_s0, %s1202_s18  ;;  %p1206_p1 = scmp.lt.u32.totalorder %s1202_s18, %s1345_s0 }
   0x7   :  { %p1208_p2 = pnand %p1206_p1, %p1203_p0 }
   0x9   :  { %1211 = shalt.err (!%p1208_p2)
}
   0xa   :  { %s1212_s23 = scalar_lea.vmem %s18_s13, 1280  ;;  %p1217_p4 = scmp.lt.s32.totalorder %s18_s13, %s18_s13 }
   0xb   :  { %p1213_p3 = scmp.ne.s32.totalorder %s18_s13, %s1212_s23  ;;  %p1218_p5 = scmp.lt.s32.totalorder %s1212_s23, %s1212_s23 }
   0xd   :  { %p1219_p6 = por %p1218_p5, %p1217_p4 }
   0xf   :  { %p1220_p7 = pnand %p1219_p6, %p1213_p3 }
  0x11   :  { %1223 = shalt.err (!%p1220_p7)
}
  0x12   :  { %20 = dma.hbm_to_vmem [thread:$0]  %s1345_s0, 1280, %s18_s13, [#allocation3]  }
  0x13   :  { %s1224_s28 = scalar_lea.hbm %s1346_s1, 10240 }
  0x14   :  { %p1225_p8 = scmp.ne.s32.totalorder %s1346_s1, %s1224_s28  ;;  %p1228_p9 = scmp.lt.u32.totalorder %s1224_s28, %s1346_s1 }
  0x16   :  { %p1230_p10 = pnand %p1228_p9, %p1225_p8 }
  0x18   :  { %1233 = shalt.err (!%p1230_p10)
}
  0x19   :  { %s1234_s6 = scalar_lea.vmem %s1299_s15, 10240  ;;  %p1239_p12 = scmp.lt.s32.totalorder %s1299_s15, %s1299_s15 }
  0x1a   :  { %p1235_p11 = scmp.ne.s32.totalorder %s1299_s15, %s1234_s6  ;;  %p1240_p13 = scmp.lt.s32.totalorder %s1234_s6, %s1234_s6 }
  0x1c   :  { %p1241_p0 = por %p1240_p13, %p1239_p12 }
  0x1e   :  { %p1242_p1 = pnand %p1241_p0, %p1235_p11 }
  0x20   :  { %1245 = shalt.err (!%p1242_p1)
}
  0x21   :  { %s1276_s0 = smov 64   ;;  %s1277_s7 = smov 4  }
  0x22   :  { %32 = dma.hbm_to_vmem [thread:$0]  %s1346_s1, 10240, %s1299_s15, [#allocation6], %s1276_s0, %s1276_s0, %s1277_s7  }
  0x23   :  { %1268 = dma.done.wait [#allocation3], 1280  }
  0x24   :  { %1269 = vsyncadd [#allocation3], 4294966016 }
  0x25   :  { %1270 = dma.done.wait [#allocation6], 10240  }
  0x26   :  { %1271 = vsyncadd [#allocation6], 4294957056  ;;  %v1122_v0 = vld [vmem:[#allocation5 + $0x40] sm:$0xff]   ;;  %v1126_v4 = vld [vmem:[#allocation5 + $0x48] sm:$0xff]  }
  0x27   :  { %v1123_v1 = vld [vmem:[#allocation5] sm:$0xff]   ;;  %1007 = vmatprep.subr.bf16.mxu0 %v1122_v0  ;;  %v1127_v5 = vld [vmem:[#allocation5 + $0x8] sm:$0xff]   ;;  %v1130_v8 = vld [vmem:[#allocation5 + $0x50] sm:$0xff]  }
  0x28   :  { %v1124_v2 = vld [vmem:[#allocation5 + $0xc0] sm:$0xff]   ;;  %1008 = vmatpush3.bf16.msra.mxu0 %v1123_v1  ;;  %v1128_v6 = vld [vmem:[#allocation5 + $0xc8] sm:$0xff]   ;;  %v1131_v9 = vld [vmem:[#allocation5 + $0x10] sm:$0xff]  }
  0x29   :  { %v1125_v3 = vld [vmem:[#allocation5 + $0x80] sm:$0xff]   ;;  %1029 = vmatprep.subr.bf16.mxu1 %v1124_v2  ;;  %1009 = vmatprep.subr.bf16.mxu0 %v1126_v4  ;;  %v1129_v7 = vld [vmem:[#allocation5 + $0x88] sm:$0xff]   ;;  %v1132_v10 = vld [vmem:[#allocation5 + $0xd0] sm:$0xff]  }
  0x2a   :  { %1030 = vmatpush3.bf16.msra.mxu1 %v1125_v3  ;;  %v1133_v11 = vld [vmem:[#allocation5 + $0x90] sm:$0xff]   ;;  %v1134_v12 = vld [vmem:[#allocation5 + $0x58] sm:$0xff]   ;;  %v1138_v16 = vld [vmem:[#allocation5 + $0x60] sm:$0xff]  }
  0x2b   :  { %1031 = vmatprep.subr.bf16.mxu1 %v1128_v6  ;;  %v1135_v13 = vld [vmem:[#allocation5 + $0x18] sm:$0xff]   ;;  %v1139_v17 = vld [vmem:[#allocation5 + $0x20] sm:$0xff]   ;;  %v1142_v20 = vld [vmem:[#allocation5 + $0x68] sm:$0xff]  }
  0x2c   :  { %1010 = vmatpush3.bf16.msra.mxu0 %v1127_v5  ;;  %v1136_v14 = vld [vmem:[#allocation5 + $0xd8] sm:$0xff]   ;;  %v1140_v18 = vld [vmem:[#allocation5 + $0xe0] sm:$0xff]   ;;  %v1143_v21 = vld [vmem:[#allocation5 + $0x28] sm:$0xff]  }
  0x2d   :  { %1011 = vmatprep.subr.bf16.mxu0 %v1130_v8  ;;  %v1137_v15 = vld [vmem:[#allocation5 + $0x98] sm:$0xff]   ;;  %v1141_v19 = vld [vmem:[#allocation5 + $0xa0] sm:$0xff]   ;;  %v1144_v22 = vld [vmem:[#allocation5 + $0xe8] sm:$0xff]  }
  0x2e   :  { %1032 = vmatpush3.bf16.msra.mxu1 %v1129_v7  ;;  %v1145_v23 = vld [vmem:[#allocation5 + $0xa8] sm:$0xff]   ;;  %v1146_v24 = vld [vmem:[#allocation5 + $0x70] sm:$0xff]   ;;  %v1150_v28 = vld [vmem:[#allocation5 + $0x78] sm:$0xff]  }
  0x2f   :  { %1033 = vmatprep.subr.bf16.mxu1 %v1132_v10  ;;  %v1147_v25 = vld [vmem:[#allocation5 + $0x30] sm:$0xff]   ;;  %v1151_v29 = vld [vmem:[#allocation5 + $0x38] sm:$0xff]   ;;  %v1154_v36 = vld [vmem:[#allocation5 + $0x140] sm:$0xff]  }
  0x30   :  { %1012 = vmatpush3.bf16.msra.mxu0 %v1131_v9  ;;  %v1148_v26 = vld [vmem:[#allocation5 + $0xf0] sm:$0xff]   ;;  %v1152_v30 = vld [vmem:[#allocation5 + $0xf8] sm:$0xff]   ;;  %v45_v37 = vld [vmem:[#allocation2 + $0x18] sm:$0xff] }
  0x31   :  { %1013 = vmatprep.subr.bf16.mxu0 %v1134_v12  ;;  %v1149_v27 = vld [vmem:[#allocation5 + $0xb0] sm:$0xff]   ;;  %v43_v31 = vld [vmem:[#allocation2 + $0x8] sm:$0xff]  ;;  %v55_v38 = vpack.c.bf16 %v45_v37, %v45_v37  ;;  %v1155_v39 = vld [vmem:[#allocation5 + $0x100] sm:$0xff]  }
  0x32   :  { %1034 = vmatpush3.bf16.msra.mxu1 %v1133_v11  ;;  %v53_v32 = vpack.c.bf16 %v43_v31, %v43_v31  ;;  %v1153_v33 = vld [vmem:[#allocation5 + $0xb8] sm:$0xff]   ;;  %v42_v34 = vld [vmem:[#allocation2] sm:$0xff]  ;;  %v44_v40 = vld [vmem:[#allocation2 + $0x10] sm:$0xff] }
  0x33   :  { %1035 = vmatprep.subr.bf16.mxu1 %v1136_v14  ;;  %v52_v35 = vpack.c.bf16 %v42_v34, %v42_v34  ;;  %781 = vmatprep.mubr.bf16.mxu1 %v55_v38  ;;  %v54_v41 = vpack.c.bf16 %v44_v40, %v44_v40  ;;  %v1156_v42 = vld [vmem:[#allocation5 + $0x1c0] sm:$0xff]   ;;  %v1158_v44 = vld [vmem:[#allocation5 + $0x148] sm:$0xff]   ;;  %v1162_v48 = vld [vmem:[#allocation5 + $0x150] sm:$0xff]  }
  0x34   :  { %1014 = vmatpush3.bf16.msra.mxu0 %v1135_v13  ;;  %741 = vmatprep.mubr.bf16.mxu0 %v53_v32  ;;  %v1157_v43 = vld [vmem:[#allocation5 + $0x180] sm:$0xff]   ;;  %v1159_v45 = vld [vmem:[#allocation5 + $0x108] sm:$0xff]   ;;  %v1163_v49 = vld [vmem:[#allocation5 + $0x110] sm:$0xff]  }
  0x35   :  { %1015 = vmatprep.subr.bf16.mxu0 %v1138_v16  ;;  %v1160_v46 = vld [vmem:[#allocation5 + $0x1c8] sm:$0xff]   ;;  %v1164_v50 = vld [vmem:[#allocation5 + $0x1d0] sm:$0xff]   ;;  %v1166_v52 = vld [vmem:[#allocation5 + $0x158] sm:$0xff]  }
  0x36   :  { %1036 = vmatpush3.bf16.msra.mxu1 %v1137_v15  ;;  %v1161_v47 = vld [vmem:[#allocation5 + $0x188] sm:$0xff]   ;;  %v1165_v51 = vld [vmem:[#allocation5 + $0x190] sm:$0xff]   ;;  %v1167_v53 = vld [vmem:[#allocation5 + $0x118] sm:$0xff]  }
  0x37   :  { %1037 = vmatprep.subr.bf16.mxu1 %v1140_v18  ;;  %v1168_v54 = vld [vmem:[#allocation5 + $0x1d8] sm:$0xff]   ;;  %v1170_v56 = vld [vmem:[#allocation5 + $0x160] sm:$0xff]   ;;  %v1174_v60 = vld [vmem:[#allocation5 + $0x168] sm:$0xff]  }
  0x38   :  { %1016 = vmatpush3.bf16.msra.mxu0 %v1139_v17  ;;  %v1169_v55 = vld [vmem:[#allocation5 + $0x198] sm:$0xff]   ;;  %v1171_v57 = vld [vmem:[#allocation5 + $0x120] sm:$0xff]   ;;  %v1175_v61 = vld [vmem:[#allocation5 + $0x128] sm:$0xff]  }
  0x39   :  { %1017 = vmatprep.subr.bf16.mxu0 %v1142_v20  ;;  %v1172_v58 = vld [vmem:[#allocation5 + $0x1e0] sm:$0xff]   ;;  %v1176_v62 = vld [vmem:[#allocation5 + $0x1e8] sm:$0xff]   ;;  %v1178_v0 = vld [vmem:[#allocation5 + $0x170] sm:$0xff]  }
  0x3a   :  { %1038 = vmatpush3.bf16.msra.mxu1 %v1141_v19  ;;  %v1173_v59 = vld [vmem:[#allocation5 + $0x1a0] sm:$0xff]   ;;  %v1177_v63 = vld [vmem:[#allocation5 + $0x1a8] sm:$0xff]   ;;  %v1179_v1 = vld [vmem:[#allocation5 + $0x130] sm:$0xff]  }
  0x3b   :  { %1039 = vmatprep.subr.bf16.mxu1 %v1144_v22  ;;  %v1180_v2 = vld [vmem:[#allocation5 + $0x1f0] sm:$0xff]   ;;  %v1182_v4 = vld [vmem:[#allocation5 + $0x178] sm:$0xff]   ;;  %v1186_v12 = vld [vmem:[#allocation5 + $0x240] sm:$0xff]  }
  0x3c   :  { %1018 = vmatpush3.bf16.msra.mxu0 %v1143_v21  ;;  %v1181_v3 = vld [vmem:[#allocation5 + $0x1b0] sm:$0xff]   ;;  %v1183_v5 = vld [vmem:[#allocation5 + $0x138] sm:$0xff]   ;;  %v49_v13 = vld [vmem:[#allocation2 + $0x38] sm:$0xff] }
  0x3d   :  { %1019 = vmatprep.subr.bf16.mxu0 %v1146_v24  ;;  %v1184_v6 = vld [vmem:[#allocation5 + $0x1f8] sm:$0xff]   ;;  %v46_v10 = vld [vmem:[#allocation2 + $0x20] sm:$0xff]  ;;  %v59_v14 = vpack.c.bf16 %v49_v13, %v49_v13  ;;  %v1187_v15 = vld [vmem:[#allocation5 + $0x200] sm:$0xff]  }
  0x3e   :  { %1040 = vmatpush3.bf16.msra.mxu1 %v1145_v23  ;;  %v47_v7 = vld [vmem:[#allocation2 + $0x28] sm:$0xff]  ;;  %v56_v11 = vpack.c.bf16 %v46_v10, %v46_v10  ;;  %v48_v16 = vld [vmem:[#allocation2 + $0x30] sm:$0xff]  ;;  %v1188_v18 = vld [vmem:[#allocation5 + $0x248] sm:$0xff]  }
  0x3f   :  { %1041 = vmatprep.subr.bf16.mxu1 %v1148_v26  ;;  %v57_v8 = vpack.c.bf16 %v47_v7, %v47_v7  ;;  %v1185_v9 = vld [vmem:[#allocation5 + $0x1b8] sm:$0xff]   ;;  %v58_v17 = vpack.c.bf16 %v48_v16, %v48_v16  ;;  %v1189_v19 = vld [vmem:[#allocation5 + $0x208] sm:$0xff]   ;;  %v1190_v20 = vld [vmem:[#allocation5 + $0x250] sm:$0xff]  }
  0x40   :  { %1020 = vmatpush3.bf16.msra.mxu0 %v1147_v25  ;;  %v1191_v21 = vld [vmem:[#allocation5 + $0x210] sm:$0xff]   ;;  %v1192_v22 = vld [vmem:[#allocation5 + $0x258] sm:$0xff]   ;;  %v1194_v24 = vld [vmem:[#allocation5 + $0x260] sm:$0xff]  }
  0x41   :  { %1021 = vmatprep.subr.bf16.mxu0 %v1150_v28  ;;  %v1193_v23 = vld [vmem:[#allocation5 + $0x218] sm:$0xff]   ;;  %v1195_v25 = vld [vmem:[#allocation5 + $0x220] sm:$0xff]   ;;  %v1199_v31 = vld [vmem:[#allocation5 + $0x230] sm:$0xff]  }
  0x42   :  { %1042 = vmatpush3.bf16.msra.mxu1 %v1149_v27  ;;  %v51_v26 = vld [vmem:[#allocation2 + $0x48] sm:$0xff]  ;;  %v1196_v27 = vld [vmem:[#allocation5 + $0x268] sm:$0xff]   ;;  %v50_v34 = vld [vmem:[#allocation2 + $0x40] sm:$0xff] }
  0x43   :  { %1043 = vmatprep.subr.bf16.mxu1 %v1152_v30  ;;  %v61_v28 = vpack.c.bf16 %v51_v26, %v51_v26  ;;  %v1198_v30 = vld [vmem:[#allocation5 + $0x270] sm:$0xff]   ;;  %v1200_v32 = vld [vmem:[#allocation5 + $0x278] sm:$0xff]  }
  0x44   :  { %1022 = vmatpush3.bf16.msra.mxu0 %v1151_v29  ;;  %v1197_v29 = vld [vmem:[#allocation5 + $0x228] sm:$0xff]   ;;  %v926_v37 = vld [vmem:[%s1347_s2] ss:$0 sm:$0xff]  ;;  %s1278_s2 = smov [#allocation7]  }
  0x45   :  { %1051 = vmatprep.subr.bf16.mxu0 %v1154_v36  ;;  %s916_s11 = sshll.u32 %s1278_s2, 4  ;;  %s917_s11 = int_to_ptr.vmem [resolvable:$true] %s916_s11 }
  0x46   :  { %1044 = vmatpush3.bf16.msra.mxu1 %v1153_v33  ;;  %v1201_v33 = vld [vmem:[#allocation5 + $0x238] sm:$0xff]   ;;  %s1246_s12 = scalar_lea.vmem %s917_s11, 128  ;;  %p1251_p3 = scmp.lt.s32.totalorder %s917_s11, %s917_s11 }
  0x47   :  { %742 = vmatmul.mubr.bf16.vlgmr.msra.gmra.mrb[0].mxu0 %v52_v35  ;;  %1073 = vmatprep.subr.bf16.mxu1 %v1156_v42  ;;  %v60_v35 = vpack.c.bf16 %v50_v34, %v50_v34  ;;  %p1247_p2 = scmp.ne.s32.totalorder %s917_s11, %s1246_s12  ;;  %p1252_p4 = scmp.lt.s32.totalorder %s1246_s12, %s1246_s12 }
  0x48   :  { %1052 = vmatpush3.bf16.msra.mxu0 %v1155_v39  ;;  %821 = vmatprep.mubr.bf16.mxu0 %v57_v8 }
  0x49   :  { %782 = vmatmul.mubr.bf16.vlgmr.msra.gmra.mrb[0].mxu1 %v54_v41  ;;  %1053 = vmatprep.subr.bf16.mxu0 %v1158_v44  ;;  %p1253_p5 = por %p1252_p4, %p1251_p3 }
  0x4a   :  { %1074 = vmatpush3.bf16.msra.mxu1 %v1157_v43  ;;  %861 = vmatprep.mubr.bf16.mxu1 %v59_v14 }
  0x4b   :  { %1075 = vmatprep.subr.bf16.mxu1 %v1160_v46  ;;  %p1254_p6 = pnand %p1253_p5, %p1247_p2 }
  0x4c   :  { %1054 = vmatpush3.bf16.msra.mxu0 %v1159_v45 }
  0x4d   :  { %1055 = vmatprep.subr.bf16.mxu0 %v1162_v48 }
  0x4e   :  { %1076 = vmatpush3.bf16.msra.mxu1 %v1161_v47 }
  0x4f   :  { %1077 = vmatprep.subr.bf16.mxu1 %v1164_v50 }
  0x50   :  { %1056 = vmatpush3.bf16.msra.mxu0 %v1163_v49 }
  0x51   :  { %1057 = vmatprep.subr.bf16.mxu0 %v1166_v52 }
  0x52   :  { %1078 = vmatpush3.bf16.msra.mxu1 %v1165_v51 }
  0x53   :  { %1079 = vmatprep.subr.bf16.mxu1 %v1168_v54 }
  0x54   :  { %1058 = vmatpush3.bf16.msra.mxu0 %v1167_v53 }
  0x55   :  { %1059 = vmatprep.subr.bf16.mxu0 %v1170_v56 }
  0x56   :  { %1080 = vmatpush3.bf16.msra.mxu1 %v1169_v55 }
  0x57   :  { %1081 = vmatprep.subr.bf16.mxu1 %v1172_v58 }
  0x58   :  { %1060 = vmatpush3.bf16.msra.mxu0 %v1171_v57 }
  0x59   :  { %1061 = vmatprep.subr.bf16.mxu0 %v1174_v60 }
  0x5a   :  { %1082 = vmatpush3.bf16.msra.mxu1 %v1173_v59 }
  0x5b   :  { %1083 = vmatprep.subr.bf16.mxu1 %v1176_v62 }
  0x5c   :  { %1062 = vmatpush3.bf16.msra.mxu0 %v1175_v61 }
  0x5d   :  { %1063 = vmatprep.subr.bf16.mxu0 %v1178_v0 }
  0x5e   :  { %1084 = vmatpush3.bf16.msra.mxu1 %v1177_v63 }
  0x5f   :  { %1085 = vmatprep.subr.bf16.mxu1 %v1180_v2 }
  0x60   :  { %1064 = vmatpush3.bf16.msra.mxu0 %v1179_v1 }
  0x61   :  { %1065 = vmatprep.subr.bf16.mxu0 %v1182_v4 }
  0x62   :  { %1086 = vmatpush3.bf16.msra.mxu1 %v1181_v3 }
  0x63   :  { %1087 = vmatprep.subr.bf16.mxu1 %v1184_v6 }
  0x64   :  { %1066 = vmatpush3.bf16.msra.mxu0 %v1183_v5 }
  0x65   :  { %1095 = vmatprep.subr.bf16.mxu0 %v1186_v12 }
  0x66   :  { %1088 = vmatpush3.bf16.msra.mxu1 %v1185_v9 }
  0x67   :  { %822 = vmatmul.mubr.bf16.vlgmr.msra.gmra.mrb[4].mxu0 %v56_v11 }
  0x68   :  { %1096 = vmatpush3.bf16.msra.mxu0 %v1187_v15  ;;  %901 = vmatprep.mubr.bf16.mxu0 %v61_v28 }
  0x69   :  { %862 = vmatmul.mubr.bf16.vlgmr.msra.gmra.mrb[4].mxu1 %v58_v17  ;;  %1097 = vmatprep.subr.bf16.mxu0 %v1188_v18 }
  0x6c   :  { %1098 = vmatpush3.bf16.msra.mxu0 %v1189_v19 }
  0x6d   :  { %1099 = vmatprep.subr.bf16.mxu0 %v1190_v20 }
  0x70   :  { %1100 = vmatpush3.bf16.msra.mxu0 %v1191_v21 }
  0x71   :  { %1101 = vmatprep.subr.bf16.mxu0 %v1192_v22 }
  0x74   :  { %1102 = vmatpush3.bf16.msra.mxu0 %v1193_v23 }
  0x75   :  { %1103 = vmatprep.subr.bf16.mxu0 %v1194_v24 }
  0x78   :  { %1104 = vmatpush3.bf16.msra.mxu0 %v1195_v25 }
  0x79   :  { %1105 = vmatprep.subr.bf16.mxu0 %v1196_v27 }
  0x7c   :  { %1106 = vmatpush3.bf16.msra.mxu0 %v1197_v29 }
  0x7d   :  { %1107 = vmatprep.subr.bf16.mxu0 %v1198_v30 }
  0x80   :  { %1108 = vmatpush3.bf16.msra.mxu0 %v1199_v31 }
  0x81   :  { %1109 = vmatprep.subr.bf16.mxu0 %v1200_v32 }
  0x84   :  { %1110 = vmatpush3.bf16.msra.mxu0 %v1201_v33 }
  0x87   :  { %902 = vmatmul.mubr.bf16.vlgmr.msra.gmra.mrb[8].mxu0 %v60_v35 }
 0x11a   :  { %v1023_v36 = vpop.f32.mrb[0].mxu0 }
 0x11b   :  { %v1024_v38 = vpop.f32.mrb[1].mxu0 }
 0x11c   :  { %v1025_v39 = vadd.f32 %v1024_v38, %v1023_v36  ;;  %v1026_v40 = vpop.f32.mrb[2].mxu0  ;;  %v1045_v41 = vpop.f32.mrb[0].mxu1 }
 0x11d   :  { %v1027_v42 = vpop.f32.mrb[3].mxu0  ;;  %v1046_v44 = vpop.f32.mrb[1].mxu1 }
 0x11e   :  { %v744_v43 = vadd.f32 %v1025_v39, %v926_v37  ;;  %v1047_v45 = vadd.f32 %v1046_v44, %v1045_v41  ;;  %v1048_v46 = vpop.f32.mrb[2].mxu1 }
 0x11f   :  { %v1049_v47 = vpop.f32.mrb[3].mxu1 }
 0x120   :  { %v784_v48 = vadd.f32 %v1047_v45, %v744_v43 }
 0x13a   :  { %v1067_v49 = vpop.f32.mrb[4].mxu0 }
 0x13b   :  { %v1068_v50 = vpop.f32.mrb[5].mxu0 }
 0x13c   :  { %v1069_v51 = vadd.f32 %v1068_v50, %v1067_v49  ;;  %v1070_v52 = vpop.f32.mrb[6].mxu0  ;;  %v1089_v53 = vpop.f32.mrb[4].mxu1 }
 0x13d   :  { %v1071_v54 = vpop.f32.mrb[7].mxu0  ;;  %v1090_v56 = vpop.f32.mrb[5].mxu1 }
 0x13e   :  { %v824_v55 = vadd.f32 %v1069_v51, %v784_v48  ;;  %v1091_v57 = vadd.f32 %v1090_v56, %v1089_v53  ;;  %v1092_v58 = vpop.f32.mrb[6].mxu1 }
 0x13f   :  { %v1093_v59 = vpop.f32.mrb[7].mxu1 }
 0x140   :  { %v864_v60 = vadd.f32 %v1091_v57, %v824_v55 }
 0x15a   :  { %v1111_v61 = vpop.f32.mrb[8].mxu0 }
 0x15b   :  { %v1112_v62 = vpop.f32.mrb[9].mxu0 }
 0x15c   :  { %v1113_v63 = vadd.f32 %v1112_v62, %v1111_v61  ;;  %v1114_v0 = vpop.f32.mrb[10].mxu0 }
 0x15d   :  { %v1115_v1 = vpop.f32.mrb[11].mxu0 }
 0x15e   :  { %v904_v2 = vadd.f32 %v1113_v63, %v864_v60 }
 0x160   :  { %909 = vst [vmem:[#allocation7] sm:$0xff] %v904_v2 }
 0x161   :  { %1257 = shalt.err (!%p1254_p6)
}
 0x162   :  { %s1258_s15 = scalar_lea.hbm %s1348_s3, 128 }
 0x163   :  { %p1259_p7 = scmp.ne.s32.totalorder %s1348_s3, %s1258_s15  ;;  %p1262_p8 = scmp.lt.u32.totalorder %s1258_s15, %s1348_s3 }
 0x165   :  { %p1264_p9 = pnand %p1262_p8, %p1259_p7 }
 0x167   :  { %1267 = shalt.err (!%p1264_p9)
}
 0x168   :  { %919 = dma.vmem_to_hbm [thread:$0]  %s917_s11, 128, %s1348_s3, [#allocation4]  }
 0x169   :  { %1272 = dma.done.wait [#allocation4], 128  }
 0x16a   :  { %1273 = vsyncadd [#allocation4], 4294967168 }
 0x16b   :  { %923 = vsyncpa [#allocation3], 1 }
 0x16c   :  { %924 = vsyncpa [#allocation6], 1 }
 0x16d   :  { %925 = vsyncpa [#allocation4], 1 }

// kernel: tpu_custom_call.1
= control target key start
LH: loop header
LB: loop body
LE: loop exit
PB: predicated region body
PF: predicated region fallthrough
CT: control target
= control target key end

     0   :  { %8 = vsyncpa [#allocation3], 0  ;;  %s1345_s0 = inlined_call_operand.hbm [shape: f32[8,1280], index: 0, kind: input, shape index: {}]   ;;  %s1346_s1 = inlined_call_operand.hbm [shape: bf16[1280,128], index: 1, kind: input, shape index: {}]   ;;  %s1347_s2 = inlined_call_operand.vmem [shape: f32[1,128], index: 2, kind: input, shape index: {}]   ;;  %s1348_s3 = inlined_call_operand.hbm [shape: f32[8,128], index: 3, kind: output, shape index: {}]  }
   0x1   :  { %9 = vsyncpa [#allocation6], 0 }
   0x2   :  { %10 = vsyncpa [#allocation4], 0  ;;  %s1274_s12 = smov [#allocation2]   ;;  %s1275_s14 = smov [#allocation5]  }
   0x3   :  { %s17_s13 = sshll.u32 %s1274_s12, 4  ;;  %s26_s15 = sshll.u32 %s1275_s14, 4  ;;  %s18_s13 = int_to_ptr.vmem [resolvable:$true] %s17_s13  ;;  %s1299_s15 = int_to_ptr.vmem [resolvable:$true] %s26_s15 }
   0x4   :  { %s1202_s18 = scalar_lea.hbm %s1345_s0, 1280 }
   0x5   :  { %p1203_p0 = scmp.ne.s32.totalorder %s1345_s0, %s1202_s18  ;;  %p1206_p1 = scmp.lt.u32.totalorder %s1202_s18, %s1345_s0 }
   0x7   :  { %p1208_p2 = pnand %p1206_p1, %p1203_p0 }
   0x9   :  { %1211 = shalt.err (!%p1208_p2)
}
   0xa   :  { %s1212_s23 = scalar_lea.vmem %s18_s13, 1280  ;;  %p1217_p4 = scmp.lt.s32.totalorder %s18_s13, %s18_s13 }
   0xb   :  { %p1213_p3 = scmp.ne.s32.totalorder %s18_s13, %s1212_s23  ;;  %p1218_p5 = scmp.lt.s32.totalorder %s1212_s23, %s1212_s23 }
   0xd   :  { %p1219_p6 = por %p1218_p5, %p1217_p4 }
   0xf   :  { %p1220_p7 = pnand %p1219_p6, %p1213_p3 }
  0x11   :  { %1223 = shalt.err (!%p1220_p7)
}
  0x12   :  { %20 = dma.hbm_to_vmem [thread:$0]  %s1345_s0, 1280, %s18_s13, [#allocation3]  }
  0x13   :  { %s1224_s28 = scalar_lea.hbm %s1346_s1, 10240 }
  0x14   :  { %p1225_p8 = scmp.ne.s32.totalorder %s1346_s1, %s1224_s28  ;;  %p1228_p9 = scmp.lt.u32.totalorder %s1224_s28, %s1346_s1 }
  0x16   :  { %p1230_p10 = pnand %p1228_p9, %p1225_p8 }
  0x18   :  { %1233 = shalt.err (!%p1230_p10)
}
  0x19   :  { %s1234_s6 = scalar_lea.vmem %s1299_s15, 10240  ;;  %p1239_p12 = scmp.lt.s32.totalorder %s1299_s15, %s1299_s15 }
  0x1a   :  { %p1235_p11 = scmp.ne.s32.totalorder %s1299_s15, %s1234_s6  ;;  %p1240_p13 = scmp.lt.s32.totalorder %s1234_s6, %s1234_s6 }
  0x1c   :  { %p1241_p0 = por %p1240_p13, %p1239_p12 }
  0x1e   :  { %p1242_p1 = pnand %p1241_p0, %p1235_p11 }
  0x20   :  { %1245 = shalt.err (!%p1242_p1)
}
  0x21   :  { %s1276_s0 = smov 64   ;;  %s1277_s7 = smov 4  }
  0x22   :  { %32 = dma.hbm_to_vmem [thread:$0]  %s1346_s1, 10240, %s1299_s15, [#allocation6], %s1276_s0, %s1276_s0, %s1277_s7  }
  0x23   :  { %1268 = dma.done.wait [#allocation3], 1280  }
  0x24   :  { %1269 = vsyncadd [#allocation3], 4294966016 }
  0x25   :  { %1270 = dma.done.wait [#allocation6], 10240  }
  0x26   :  { %1271 = vsyncadd [#allocation6], 4294957056  ;;  %v1122_v0 = vld [vmem:[#allocation5 + $0x40] sm:$0xff]   ;;  %v1126_v4 = vld [vmem:[#allocation5 + $0x48] sm:$0xff]  }
  0x27   :  { %v1123_v1 = vld [vmem:[#allocation5] sm:$0xff]   ;;  %1007 = vmatprep.subr.bf16.mxu0 %v1122_v0  ;;  %v1127_v5 = vld [vmem:[#allocation5 + $0x8] sm:$0xff]   ;;  %v1130_v8 = vld [vmem:[#allocation5 + $0x50] sm:$0xff]  }
  0x28   :  { %v1124_v2 = vld [vmem:[#allocation5 + $0xc0] sm:$0xff]   ;;  %1008 = vmatpush3.bf16.msra.mxu0 %v1123_v1  ;;  %v1128_v6 = vld [vmem:[#allocation5 + $0xc8] sm:$0xff]   ;;  %v1131_v9 = vld [vmem:[#allocation5 + $0x10] sm:$0xff]  }
  0x29   :  { %v1125_v3 = vld [vmem:[#allocation5 + $0x80] sm:$0xff]   ;;  %1029 = vmatprep.subr.bf16.mxu1 %v1124_v2  ;;  %1009 = vmatprep.subr.bf16.mxu0 %v1126_v4  ;;  %v1129_v7 = vld [vmem:[#allocation5 + $0x88] sm:$0xff]   ;;  %v1132_v10 = vld [vmem:[#allocation5 + $0xd0] sm:$0xff]  }
  0x2a   :  { %1030 = vmatpush3.bf16.msra.mxu1 %v1125_v3  ;;  %v1133_v11 = vld [vmem:[#allocation5 + $0x90] sm:$0xff]   ;;  %v1134_v12 = vld [vmem:[#allocation5 + $0x58] sm:$0xff]   ;;  %v1138_v16 = vld [vmem:[#allocation5 + $0x60] sm:$0xff]  }
  0x2b   :  { %1031 = vmatprep.subr.bf16.mxu1 %v1128_v6  ;;  %v1135_v13 = vld [vmem:[#allocation5 + $0x18] sm:$0xff]   ;;  %v1139_v17 = vld [vmem:[#allocation5 + $0x20] sm:$0xff]   ;;  %v1142_v20 = vld [vmem:[#allocation5 + $0x68] sm:$0xff]  }
  0x2c   :  { %1010 = vmatpush3.bf16.msra.mxu0 %v1127_v5  ;;  %v1136_v14 = vld [vmem:[#allocation5 + $0xd8] sm:$0xff]   ;;  %v1140_v18 = vld [vmem:[#allocation5 + $0xe0] sm:$0xff]   ;;  %v1143_v21 = vld [vmem:[#allocation5 + $0x28] sm:$0xff]  }
  0x2d   :  { %1011 = vmatprep.subr.bf16.mxu0 %v1130_v8  ;;  %v1137_v15 = vld [vmem:[#allocation5 + $0x98] sm:$0xff]   ;;  %v1141_v19 = vld [vmem:[#allocation5 + $0xa0] sm:$0xff]   ;;  %v1144_v22 = vld [vmem:[#allocation5 + $0xe8] sm:$0xff]  }
  0x2e   :  { %1032 = vmatpush3.bf16.msra.mxu1 %v1129_v7  ;;  %v1145_v23 = vld [vmem:[#allocation5 + $0xa8] sm:$0xff]   ;;  %v1146_v24 = vld [vmem:[#allocation5 + $0x70] sm:$0xff]   ;;  %v1150_v28 = vld [vmem:[#allocation5 + $0x78] sm:$0xff]  }
  0x2f   :  { %1033 = vmatprep.subr.bf16.mxu1 %v1132_v10  ;;  %v1147_v25 = vld [vmem:[#allocation5 + $0x30] sm:$0xff]   ;;  %v1151_v29 = vld [vmem:[#allocation5 + $0x38] sm:$0xff]   ;;  %v1154_v36 = vld [vmem:[#allocation5 + $0x140] sm:$0xff]  }
  0x30   :  { %1012 = vmatpush3.bf16.msra.mxu0 %v1131_v9  ;;  %v1148_v26 = vld [vmem:[#allocation5 + $0xf0] sm:$0xff]   ;;  %v1152_v30 = vld [vmem:[#allocation5 + $0xf8] sm:$0xff]   ;;  %v45_v37 = vld [vmem:[#allocation2 + $0x18] sm:$0xff] }
  0x31   :  { %1013 = vmatprep.subr.bf16.mxu0 %v1134_v12  ;;  %v1149_v27 = vld [vmem:[#allocation5 + $0xb0] sm:$0xff]   ;;  %v43_v31 = vld [vmem:[#allocation2 + $0x8] sm:$0xff]  ;;  %v55_v38 = vpack.c.bf16 %v45_v37, %v45_v37  ;;  %v1155_v39 = vld [vmem:[#allocation5 + $0x100] sm:$0xff]  }
  0x32   :  { %1034 = vmatpush3.bf16.msra.mxu1 %v1133_v11  ;;  %v53_v32 = vpack.c.bf16 %v43_v31, %v43_v31  ;;  %v1153_v33 = vld [vmem:[#allocation5 + $0xb8] sm:$0xff]   ;;  %v42_v34 = vld [vmem:[#allocation2] sm:$0xff]  ;;  %v44_v40 = vld [vmem:[#allocation2 + $0x10] sm:$0xff] }
  0x33   :  { %1035 = vmatprep.subr.bf16.mxu1 %v1136_v14  ;;  %v52_v35 = vpack.c.bf16 %v42_v34, %v42_v34  ;;  %781 = vmatprep.mubr.bf16.mxu1 %v55_v38  ;;  %v54_v41 = vpack.c.bf16 %v44_v40, %v44_v40  ;;  %v1156_v42 = vld [vmem:[#allocation5 + $0x1c0] sm:$0xff]   ;;  %v1158_v44 = vld [vmem:[#allocation5 + $0x148] sm:$0xff]   ;;  %v1162_v48 = vld [vmem:[#allocation5 + $0x150] sm:$0xff]  }
  0x34   :  { %1014 = vmatpush3.bf16.msra.mxu0 %v1135_v13  ;;  %741 = vmatprep.mubr.bf16.mxu0 %v53_v32  ;;  %v1157_v43 = vld [vmem:[#allocation5 + $0x180] sm:$0xff]   ;;  %v1159_v45 = vld [vmem:[#allocation5 + $0x108] sm:$0xff]   ;;  %v1163_v49 = vld [vmem:[#allocation5 + $0x110] sm:$0xff]  }
  0x35   :  { %1015 = vmatprep.subr.bf16.mxu0 %v1138_v16  ;;  %v1160_v46 = vld [vmem:[#allocation5 + $0x1c8] sm:$0xff]   ;;  %v1164_v50 = vld [vmem:[#allocation5 + $0x1d0] sm:$0xff]   ;;  %v1166_v52 = vld [vmem:[#allocation5 + $0x158] sm:$0xff]  }
  0x36   :  { %1036 = vmatpush3.bf16.msra.mxu1 %v1137_v15  ;;  %v1161_v47 = vld [vmem:[#allocation5 + $0x188] sm:$0xff]   ;;  %v1165_v51 = vld [vmem:[#allocation5 + $0x190] sm:$0xff]   ;;  %v1167_v53 = vld [vmem:[#allocation5 + $0x118] sm:$0xff]  }
  0x37   :  { %1037 = vmatprep.subr.bf16.mxu1 %v1140_v18  ;;  %v1168_v54 = vld [vmem:[#allocation5 + $0x1d8] sm:$0xff]   ;;  %v1170_v56 = vld [vmem:[#allocation5 + $0x160] sm:$0xff]   ;;  %v1174_v60 = vld [vmem:[#allocation5 + $0x168] sm:$0xff]  }
  0x38   :  { %1016 = vmatpush3.bf16.msra.mxu0 %v1139_v17  ;;  %v1169_v55 = vld [vmem:[#allocation5 + $0x198] sm:$0xff]   ;;  %v1171_v57 = vld [vmem:[#allocation5 + $0x120] sm:$0xff]   ;;  %v1175_v61 = vld [vmem:[#allocation5 + $0x128] sm:$0xff]  }
  0x39   :  { %1017 = vmatprep.subr.bf16.mxu0 %v1142_v20  ;;  %v1172_v58 = vld [vmem:[#allocation5 + $0x1e0] sm:$0xff]   ;;  %v1176_v62 = vld [vmem:[#allocation5 + $0x1e8] sm:$0xff]   ;;  %v1178_v0 = vld [vmem:[#allocation5 + $0x170] sm:$0xff]  }
  0x3a   :  { %1038 = vmatpush3.bf16.msra.mxu1 %v1141_v19  ;;  %v1173_v59 = vld [vmem:[#allocation5 + $0x1a0] sm:$0xff]   ;;  %v1177_v63 = vld [vmem:[#allocation5 + $0x1a8] sm:$0xff]   ;;  %v1179_v1 = vld [vmem:[#allocation5 + $0x130] sm:$0xff]  }
  0x3b   :  { %1039 = vmatprep.subr.bf16.mxu1 %v1144_v22  ;;  %v1180_v2 = vld [vmem:[#allocation5 + $0x1f0] sm:$0xff]   ;;  %v1182_v4 = vld [vmem:[#allocation5 + $0x178] sm:$0xff]   ;;  %v1186_v12 = vld [vmem:[#allocation5 + $0x240] sm:$0xff]  }
  0x3c   :  { %1018 = vmatpush3.bf16.msra.mxu0 %v1143_v21  ;;  %v1181_v3 = vld [vmem:[#allocation5 + $0x1b0] sm:$0xff]   ;;  %v1183_v5 = vld [vmem:[#allocation5 + $0x138] sm:$0xff]   ;;  %v49_v13 = vld [vmem:[#allocation2 + $0x38] sm:$0xff] }
  0x3d   :  { %1019 = vmatprep.subr.bf16.mxu0 %v1146_v24  ;;  %v1184_v6 = vld [vmem:[#allocation5 + $0x1f8] sm:$0xff]   ;;  %v46_v10 = vld [vmem:[#allocation2 + $0x20] sm:$0xff]  ;;  %v59_v14 = vpack.c.bf16 %v49_v13, %v49_v13  ;;  %v1187_v15 = vld [vmem:[#allocation5 + $0x200] sm:$0xff]  }
  0x3e   :  { %1040 = vmatpush3.bf16.msra.mxu1 %v1145_v23  ;;  %v47_v7 = vld [vmem:[#allocation2 + $0x28] sm:$0xff]  ;;  %v56_v11 = vpack.c.bf16 %v46_v10, %v46_v10  ;;  %v48_v16 = vld [vmem:[#allocation2 + $0x30] sm:$0xff]  ;;  %v1188_v18 = vld [vmem:[#allocation5 + $0x248] sm:$0xff]  }
  0x3f   :  { %1041 = vmatprep.subr.bf16.mxu1 %v1148_v26  ;;  %v57_v8 = vpack.c.bf16 %v47_v7, %v47_v7  ;;  %v1185_v9 = vld [vmem:[#allocation5 + $0x1b8] sm:$0xff]   ;;  %v58_v17 = vpack.c.bf16 %v48_v16, %v48_v16  ;;  %v1189_v19 = vld [vmem:[#allocation5 + $0x208] sm:$0xff]   ;;  %v1190_v20 = vld [vmem:[#allocation5 + $0x250] sm:$0xff]  }
  0x40   :  { %1020 = vmatpush3.bf16.msra.mxu0 %v1147_v25  ;;  %v1191_v21 = vld [vmem:[#allocation5 + $0x210] sm:$0xff]   ;;  %v1192_v22 = vld [vmem:[#allocation5 + $0x258] sm:$0xff]   ;;  %v1194_v24 = vld [vmem:[#allocation5 + $0x260] sm:$0xff]  }
  0x41   :  { %1021 = vmatprep.subr.bf16.mxu0 %v1150_v28  ;;  %v1193_v23 = vld [vmem:[#allocation5 + $0x218] sm:$0xff]   ;;  %v1195_v25 = vld [vmem:[#allocation5 + $0x220] sm:$0xff]   ;;  %v1199_v31 = vld [vmem:[#allocation5 + $0x230] sm:$0xff]  }
  0x42   :  { %1042 = vmatpush3.bf16.msra.mxu1 %v1149_v27  ;;  %v51_v26 = vld [vmem:[#allocation2 + $0x48] sm:$0xff]  ;;  %v1196_v27 = vld [vmem:[#allocation5 + $0x268] sm:$0xff]   ;;  %v50_v34 = vld [vmem:[#allocation2 + $0x40] sm:$0xff] }
  0x43   :  { %1043 = vmatprep.subr.bf16.mxu1 %v1152_v30  ;;  %v61_v28 = vpack.c.bf16 %v51_v26, %v51_v26  ;;  %v1198_v30 = vld [vmem:[#allocation5 + $0x270] sm:$0xff]   ;;  %v1200_v32 = vld [vmem:[#allocation5 + $0x278] sm:$0xff]  }
  0x44   :  { %1022 = vmatpush3.bf16.msra.mxu0 %v1151_v29  ;;  %v1197_v29 = vld [vmem:[#allocation5 + $0x228] sm:$0xff]   ;;  %v926_v37 = vld [vmem:[%s1347_s2] ss:$0 sm:$0xff]  ;;  %s1278_s2 = smov [#allocation7]  }
  0x45   :  { %1051 = vmatprep.subr.bf16.mxu0 %v1154_v36  ;;  %s916_s11 = sshll.u32 %s1278_s2, 4  ;;  %s917_s11 = int_to_ptr.vmem [resolvable:$true] %s916_s11 }
  0x46   :  { %1044 = vmatpush3.bf16.msra.mxu1 %v1153_v33  ;;  %v1201_v33 = vld [vmem:[#allocation5 + $0x238] sm:$0xff]   ;;  %s1246_s12 = scalar_lea.vmem %s917_s11, 128  ;;  %p1251_p3 = scmp.lt.s32.totalorder %s917_s11, %s917_s11 }
  0x47   :  { %742 = vmatmul.mubr.bf16.vlgmr.msra.gmra.mrb[0].mxu0 %v52_v35  ;;  %1073 = vmatprep.subr.bf16.mxu1 %v1156_v42  ;;  %v60_v35 = vpack.c.bf16 %v50_v34, %v50_v34  ;;  %p1247_p2 = scmp.ne.s32.totalorder %s917_s11, %s1246_s12  ;;  %p1252_p4 = scmp.lt.s32.totalorder %s1246_s12, %s1246_s12 }
  0x48   :  { %1052 = vmatpush3.bf16.msra.mxu0 %v1155_v39  ;;  %821 = vmatprep.mubr.bf16.mxu0 %v57_v8 }
  0x49   :  { %782 = vmatmul.mubr.bf16.vlgmr.msra.gmra.mrb[0].mxu1 %v54_v41  ;;  %1053 = vmatprep.subr.bf16.mxu0 %v1158_v44  ;;  %p1253_p5 = por %p1252_p4, %p1251_p3 }
  0x4a   :  { %1074 = vmatpush3.bf16.msra.mxu1 %v1157_v43  ;;  %861 = vmatprep.mubr.bf16.mxu1 %v59_v14 }
  0x4b   :  { %1075 = vmatprep.subr.bf16.mxu1 %v1160_v46  ;;  %p1254_p6 = pnand %p1253_p5, %p1247_p2 }
  0x4c   :  { %1054 = vmatpush3.bf16.msra.mxu0 %v1159_v45 }
  0x4d   :  { %1055 = vmatprep.subr.bf16.mxu0 %v1162_v48 }
  0x4e   :  { %1076 = vmatpush3.bf16.msra.mxu1 %v1161_v47 }
  0x4f   :  { %1077 = vmatprep.subr.bf16.mxu1 %v1164_v50 }
  0x50   :  { %1056 = vmatpush3.bf16.msra.mxu0 %v1163_v49 }
  0x51   :  { %1057 = vmatprep.subr.bf16.mxu0 %v1166_v52 }
  0x52   :  { %1078 = vmatpush3.bf16.msra.mxu1 %v1165_v51 }
  0x53   :  { %1079 = vmatprep.subr.bf16.mxu1 %v1168_v54 }
  0x54   :  { %1058 = vmatpush3.bf16.msra.mxu0 %v1167_v53 }
  0x55   :  { %1059 = vmatprep.subr.bf16.mxu0 %v1170_v56 }
  0x56   :  { %1080 = vmatpush3.bf16.msra.mxu1 %v1169_v55 }
  0x57   :  { %1081 = vmatprep.subr.bf16.mxu1 %v1172_v58 }
  0x58   :  { %1060 = vmatpush3.bf16.msra.mxu0 %v1171_v57 }
  0x59   :  { %1061 = vmatprep.subr.bf16.mxu0 %v1174_v60 }
  0x5a   :  { %1082 = vmatpush3.bf16.msra.mxu1 %v1173_v59 }
  0x5b   :  { %1083 = vmatprep.subr.bf16.mxu1 %v1176_v62 }
  0x5c   :  { %1062 = vmatpush3.bf16.msra.mxu0 %v1175_v61 }
  0x5d   :  { %1063 = vmatprep.subr.bf16.mxu0 %v1178_v0 }
  0x5e   :  { %1084 = vmatpush3.bf16.msra.mxu1 %v1177_v63 }
  0x5f   :  { %1085 = vmatprep.subr.bf16.mxu1 %v1180_v2 }
  0x60   :  { %1064 = vmatpush3.bf16.msra.mxu0 %v1179_v1 }
  0x61   :  { %1065 = vmatprep.subr.bf16.mxu0 %v1182_v4 }
  0x62   :  { %1086 = vmatpush3.bf16.msra.mxu1 %v1181_v3 }
  0x63   :  { %1087 = vmatprep.subr.bf16.mxu1 %v1184_v6 }
  0x64   :  { %1066 = vmatpush3.bf16.msra.mxu0 %v1183_v5 }
  0x65   :  { %1095 = vmatprep.subr.bf16.mxu0 %v1186_v12 }
  0x66   :  { %1088 = vmatpush3.bf16.msra.mxu1 %v1185_v9 }
  0x67   :  { %822 = vmatmul.mubr.bf16.vlgmr.msra.gmra.mrb[4].mxu0 %v56_v11 }
  0x68   :  { %1096 = vmatpush3.bf16.msra.mxu0 %v1187_v15  ;;  %901 = vmatprep.mubr.bf16.mxu0 %v61_v28 }
  0x69   :  { %862 = vmatmul.mubr.bf16.vlgmr.msra.gmra.mrb[4].mxu1 %v58_v17  ;;  %1097 = vmatprep.subr.bf16.mxu0 %v1188_v18 }
  0x6c   :  { %1098 = vmatpush3.bf16.msra.mxu0 %v1189_v19 }
  0x6d   :  { %1099 = vmatprep.subr.bf16.mxu0 %v1190_v20 }
  0x70   :  { %1100 = vmatpush3.bf16.msra.mxu0 %v1191_v21 }
  0x71   :  { %1101 = vmatprep.subr.bf16.mxu0 %v1192_v22 }
  0x74   :  { %1102 = vmatpush3.bf16.msra.mxu0 %v1193_v23 }
  0x75   :  { %1103 = vmatprep.subr.bf16.mxu0 %v1194_v24 }
  0x78   :  { %1104 = vmatpush3.bf16.msra.mxu0 %v1195_v25 }
  0x79   :  { %1105 = vmatprep.subr.bf16.mxu0 %v1196_v27 }
  0x7c   :  { %1106 = vmatpush3.bf16.msra.mxu0 %v1197_v29 }
  0x7d   :  { %1107 = vmatprep.subr.bf16.mxu0 %v1198_v30 }
  0x80   :  { %1108 = vmatpush3.bf16.msra.mxu0 %v1199_v31 }
  0x81   :  { %1109 = vmatprep.subr.bf16.mxu0 %v1200_v32 }
  0x84   :  { %1110 = vmatpush3.bf16.msra.mxu0 %v1201_v33 }
  0x87   :  { %902 = vmatmul.mubr.bf16.vlgmr.msra.gmra.mrb[8].mxu0 %v60_v35 }
 0x11a   :  { %v1023_v36 = vpop.f32.mrb[0].mxu0 }
 0x11b   :  { %v1024_v38 = vpop.f32.mrb[1].mxu0 }
 0x11c   :  { %v1025_v39 = vadd.f32 %v1024_v38, %v1023_v36  ;;  %v1026_v40 = vpop.f32.mrb[2].mxu0  ;;  %v1045_v41 = vpop.f32.mrb[0].mxu1 }
 0x11d   :  { %v1027_v42 = vpop.f32.mrb[3].mxu0  ;;  %v1046_v44 = vpop.f32.mrb[1].mxu1 }
 0x11e   :  { %v744_v43 = vadd.f32 %v1025_v39, %v926_v37  ;;  %v1047_v45 = vadd.f32 %v1046_v44, %v1045_v41  ;;  %v1048_v46 = vpop.f32.mrb[2].mxu1 }
 0x11f   :  { %v1049_v47 = vpop.f32.mrb[3].mxu1 }
 0x120   :  { %v784_v48 = vadd.f32 %v1047_v45, %v744_v43 }
 0x13a   :  { %v1067_v49 = vpop.f32.mrb[4].mxu0 }
 0x13b   :  { %v1068_v50 = vpop.f32.mrb[5].mxu0 }
 0x13c   :  { %v1069_v51 = vadd.f32 %v1068_v50, %v1067_v49  ;;  %v1070_v52 = vpop.f32.mrb[6].mxu0  ;;  %v1089_v53 = vpop.f32.mrb[4].mxu1 }
 0x13d   :  { %v1071_v54 = vpop.f32.mrb[7].mxu0  ;;  %v1090_v56 = vpop.f32.mrb[5].mxu1 }
 0x13e   :  { %v824_v55 = vadd.f32 %v1069_v51, %v784_v48  ;;  %v1091_v57 = vadd.f32 %v1090_v56, %v1089_v53  ;;  %v1092_v58 = vpop.f32.mrb[6].mxu1 }
 0x13f   :  { %v1093_v59 = vpop.f32.mrb[7].mxu1 }
 0x140   :  { %v864_v60 = vadd.f32 %v1091_v57, %v824_v55 }
 0x15a   :  { %v1111_v61 = vpop.f32.mrb[8].mxu0 }
 0x15b   :  { %v1112_v62 = vpop.f32.mrb[9].mxu0 }
 0x15c   :  { %v1113_v63 = vadd.f32 %v1112_v62, %v1111_v61  ;;  %v1114_v0 = vpop.f32.mrb[10].mxu0 }
 0x15d   :  { %v1115_v1 = vpop.f32.mrb[11].mxu0 }
 0x15e   :  { %v904_v2 = vadd.f32 %v1113_v63, %v864_v60 }
 0x160   :  { %909 = vst [vmem:[#allocation7] sm:$0xff] %v904_v2 }
 0x161   :  { %1257 = shalt.err (!%p1254_p6)
}
 0x162   :  { %s1258_s15 = scalar_lea.hbm %s1348_s3, 128 }
 0x163   :  { %p1259_p7 = scmp.ne.s32.totalorder %s1348_s3, %s1258_s15  ;;  %p1262_p8 = scmp.lt.u32.totalorder %s1258_s15, %s1348_s3 }
 0x165   :  { %p1264_p9 = pnand %p1262_p8, %p1259_p7 }
 0x167   :  { %1267 = shalt.err (!%p1264_p9)
}
 0x168   :  { %919 = dma.vmem_to_hbm [thread:$0]  %s917_s11, 128, %s1348_s3, [#allocation4]  }
 0x169   :  { %1272 = dma.done.wait [#allocation4], 128  }
 0x16a   :  { %1273 = vsyncadd [#allocation4], 4294967168 }
 0x16b   :  { %923 = vsyncpa [#allocation3], 1 }
 0x16c   :  { %924 = vsyncpa [#allocation6], 1 }
 0x16d   :  { %925 = vsyncpa [#allocation4], 1 }

</bundles_post_ra>
